<compile_context>
chip_gen: v7x
topology: tpu7x:2x2x1
jax: 0.10.0
libtpu: 0.0.40
codegen_flags: <defaults>
</compile_context>

<pallas_src>
import jax
import jax.numpy as jnp
from jax.experimental import pallas as pl
from jax.experimental.pallas import tpu as pltpu

_LANE = 128


def _dne_add_kernel(x_ref, n_ref, o_ref):
    # Elementwise hot path: one (bb, br, bl) tile per grid step.
    # Output dtype follows x (documented; PyTorch promotion differs only for
    # mixed dtypes, which the module never produces: noise is created as
    # zeros with the activation dtype).
    o_ref[...] = x_ref[...] + n_ref[...].astype(o_ref.dtype)


def _sublane_multiple(*dtypes) -> int:
    # Packed sublane multiple: 8 rows for 32-bit, 16 for 16-bit, 32 for 8-bit.
    return max({4: 8, 2: 16, 1: 32}.get(jnp.dtype(d).itemsize, 8) for d in dtypes)


def _round_up(a: int, b: int) -> int:
    return (a + b - 1) // b * b


def _tile_params():
    """Per-generation (per-input tile bytes, vmem_limit_bytes or None)."""
    kind = ""
    try:
        kind = jax.devices()[0].device_kind.lower()
    except Exception:  # defensive: e.g. interpret / CPU tracing
        pass
    if "v5e" in kind or "v5 lite" in kind or "v5litepod" in kind:
        # ~0.8 TB/s HBM: a 2 MiB/input step is ~7 us of DMA, so the ~0.35 us
        # per-step overhead is already <5%.  3 arrays x 2 bufs = 12 MiB fits
        # the 16 MiB default scoped VMEM, so don't override the limit.
        return 2 * 1024 * 1024, None
    if "v7" in kind:
        # ~3.2 TB/s HBM: grow tiles so the fixed per-step overhead stays <10%;
        # 3 arrays x 2 bufs x 6 MiB = 36 MiB < 64 MiB physical VMEM.
        return 6 * 1024 * 1024, 48 * 1024 * 1024
    # v6e-class default (also fine for v5p / unknown): 4 MiB tiles,
    # 24 MiB double-buffered, inside a 32 MiB scoped-VMEM limit.
    return 4 * 1024 * 1024, 32 * 1024 * 1024


def _pick_blocks(B, R, L, sub, itemsize, target):
    """Pick (bb, br, bl) whose padded VMEM footprint stays <= target bytes."""
    # Lane dim: keep the full extent unless even a single `sub`-row slab blows
    # the budget; a partial last lane-block is masked by the cdiv grid.
    if L <= _LANE or _round_up(L, _LANE) * sub * itemsize <= target:
        bl = L
    else:
        bl = max(_LANE, (target // (sub * itemsize)) // _LANE * _LANE)
        if bl >= L:
            bl = L
    bl_pad = _round_up(bl, _LANE)

    # Row dim: largest multiple of `sub` under budget, or the full extent.
    rows_cap = max(sub, (target // (bl_pad * itemsize)) // sub * sub)
    br = R if R <= rows_cap else rows_cap

    # Leading dim: only grow when the (R, L) slab is whole so every non-final
    # block is identical; partial leading blocks are masked too.
    if br == R and bl == L:
        slab = _round_up(R, sub) * bl_pad * itemsize
        bb = max(1, min(B, target // max(1, slab)))
    else:
        bb = 1
    return bb, br, bl


def dne_layer(x: jax.Array, noise: jax.Array, *, donate_x: bool = False) -> jax.Array:
    """Forward pass of DNELayer: x + noise (noise has the same shape as x)."""
    assert x.shape == noise.shape, "DNELayer noise must match input shape"
    orig_shape = x.shape
    out_dtype = x.dtype

    if x.ndim == 0 or x.size == 0:
        # Degenerate scalar / empty input: nothing for a kernel to do.
        return (x + noise.astype(out_dtype)).astype(out_dtype)

    # Collapse leading dims -> (B, R, L).  Only dims above the (sublane, lane)
    # pair are merged, so this reshape is a free bitcast (no relayout copy).
    L = orig_shape[-1]
    R = orig_shape[-2] if x.ndim >= 2 else 1
    B = x.size // (R * L)
    x3 = x.reshape(B, R, L)
    n3 = noise.reshape(B, R, L)

    itemsize = jnp.dtype(out_dtype).itemsize
    sub = _sublane_multiple(out_dtype, noise.dtype)
    target, vmem_limit = _tile_params()
    bb, br, bl = _pick_blocks(B, R, L, sub, itemsize, target)
    grid = (pl.cdiv(B, bb), pl.cdiv(R, br), pl.cdiv(L, bl))

    compiler_kwargs = dict(dimension_semantics=("parallel", "parallel", "parallel"))
    if vmem_limit is not None:
        compiler_kwargs["vmem_limit_bytes"] = vmem_limit

    spec = pl.BlockSpec((bb, br, bl), lambda b, r, l: (b, r, l))

    out3 = pl.pallas_call(
        _dne_add_kernel,
        out_shape=jax.ShapeDtypeStruct((B, R, L), out_dtype),
        grid_spec=pltpu.PrefetchScalarGridSpec(
            num_scalar_prefetch=0,
            grid=grid,
            in_specs=[spec, spec],
            out_specs=spec,
        ),
        compiler_params=pltpu.CompilerParams(**compiler_kwargs),
        # Alias x's HBM buffer only when the caller donates x (x dead after the
        # call); otherwise XLA inserts a defensive full copy of x.
        input_output_aliases={0: 0} if donate_x else {},
        cost_estimate=pl.CostEstimate(
            flops=x.size,
            transcendentals=0,
            bytes_accessed=2 * x.size * itemsize
            + noise.size * jnp.dtype(noise.dtype).itemsize,
        ),
    )(x3, n3)

    return out3.reshape(orig_shape)


if __name__ == "__main__":
    # Small NCHW-shaped input, consistent with typical DNE usage on images.
    shape = (2, 4, 16, 16)
    key = jax.random.PRNGKey(0)
    x = jax.random.normal(key, shape, dtype=jnp.float32)

    # Parameter init exactly as in the PyTorch module: torch.zeros(shape).
    noise = jnp.zeros(shape, dtype=jnp.float32)

    out = jax.block_until_ready(dne_layer(x, noise))
    ref = x + noise
    assert out.shape == shape and out.dtype == x.dtype
    assert jnp.allclose(out, ref, atol=1e-6), "mismatch vs reference"

    # Extra coverage: ragged dims (masked block tails, no pad pass), bf16
    # sublane packing, 1-D / 2-D views, and a slab big enough for a
    # multi-step grid over the leading dim.
    for extra_shape, dt in (
        ((2, 3, 17, 19), jnp.float32),      # ragged H/W -> masked tails
        ((2, 4, 16, 16), jnp.bfloat16),     # 16-row sublane packing
        ((1000,), jnp.float32),             # 1-D parameter
        ((136, 272), jnp.float32),          # 2-D, non-multiple of (8, 128)
        ((16, 8, 128, 128), jnp.float32),   # 8 MiB slab -> multi-step grid
    ):
        k1, k2, key = jax.random.split(key, 3)
        xe = jax.random.normal(k1, extra_shape, dtype=dt)
        ne = (0.01 * jax.random.normal(k2, extra_shape, dtype=jnp.float32)).astype(dt)
        oe = jax.block_until_ready(dne_layer(xe, ne))
        tol = 2e-2 if dt == jnp.bfloat16 else 1e-6
        assert oe.shape == extra_shape and oe.dtype == dt
        assert jnp.allclose(oe, xe + ne, atol=tol), f"mismatch for {extra_shape} {dt}"

    print("KERNEL_OK")
</pallas_src>

<mosaic_0001>
module attributes {stable_mosaic.version = 11 : i64} {
  func.func @_dne_add_kernel(%arg0: i32, %arg1: i32, %arg2: i32, %arg3: memref<8x16x16xf32, #tpu.memory_space<vmem>>, %arg4: memref<8x16x16xf32, #tpu.memory_space<vmem>>, %arg5: memref<8x16x16xf32, #tpu.memory_space<vmem>>) attributes {dimension_semantics = [#tpu.dimension_semantics<parallel>, #tpu.dimension_semantics<parallel>, #tpu.dimension_semantics<parallel>], iteration_bounds = array<i64: 1, 1, 1>, scalar_prefetch = 0 : i64, scratch_operands = 0 : i64, tpu.core_type = #tpu.core_type<tc>, window_params = [{transform_indices = @transform_0, window_bounds = array<i64: 8, 16, 16>}, {transform_indices = @transform_1, window_bounds = array<i64: 8, 16, 16>}, {transform_indices = @transform_2, window_bounds = array<i64: 8, 16, 16>}]} {
    %c0 = arith.constant 0 : index
    %c0_0 = arith.constant 0 : index
    %c0_1 = arith.constant 0 : index
    %0 = vector.load %arg3[%c0, %c0_0, %c0_1] : memref<8x16x16xf32, #tpu.memory_space<vmem>>, vector<8x16x16xf32>
    %c0_2 = arith.constant 0 : index
    %c0_3 = arith.constant 0 : index
    %c0_4 = arith.constant 0 : index
    %1 = vector.load %arg4[%c0_2, %c0_3, %c0_4] : memref<8x16x16xf32, #tpu.memory_space<vmem>>, vector<8x16x16xf32>
    %2 = arith.addf %0, %1 : vector<8x16x16xf32>
    %c0_5 = arith.constant 0 : index
    %c0_6 = arith.constant 0 : index
    %c0_7 = arith.constant 0 : index
    %3 = vector.load %arg5[%c0_5, %c0_6, %c0_7] : memref<8x16x16xf32, #tpu.memory_space<vmem>>, vector<8x16x16xf32>
    tpu.vector_store %arg5[%c0_5, %c0_6, %c0_7], %2 {strides = array<i32>} : memref<8x16x16xf32, #tpu.memory_space<vmem>>, vector<8x16x16xf32>,
    return
  }
  func.func @transform_0(%arg0: i32, %arg1: i32, %arg2: i32) -> (i32, i32, i32) {
    %c0_i32 = arith.constant 0 : i32
    return %arg0, %arg1, %arg2 : i32, i32, i32
  }
  func.func @transform_1(%arg0: i32, %arg1: i32, %arg2: i32) -> (i32, i32, i32) {
    %c0_i32 = arith.constant 0 : i32
    return %arg0, %arg1, %arg2 : i32, i32, i32
  }
  func.func @transform_2(%arg0: i32, %arg1: i32, %arg2: i32) -> (i32, i32, i32) {
    %c0_i32 = arith.constant 0 : i32
    return %arg0, %arg1, %arg2 : i32, i32, i32
  }
}

</mosaic_0001>

<bundles_post_ra>
// kernel: tpu_custom_call.1
= control target key start
LH: loop header
LB: loop body
LE: loop exit
PB: predicated region body
PF: predicated region fallthrough
CT: control target
= control target key end

     0   :  { %7 = vsyncpa [#allocation3], 0  ;;  %s281_s0 = inlined_call_operand.hbm [shape: f32[8,16,16], index: 0, kind: input, shape index: {}]   ;;  %s282_s1 = inlined_call_operand.hbm [shape: f32[8,16,16], index: 1, kind: input, shape index: {}]   ;;  %s283_s2 = inlined_call_operand.hbm [shape: f32[8,16,16], index: 2, kind: output, shape index: {}]  }
   0x1   :  { %8 = vsyncpa [#allocation6], 0 }
   0x2   :  { %9 = vsyncpa [#allocation4], 0  ;;  %s200_s9 = smov [#allocation2]   ;;  %s128_s13 = scalar_lea.hbm %s281_s0, 2048 }
   0x3   :  { %s15_s10 = sshll.u32 %s200_s9, 4  ;;  %p129_p0 = scmp.ne.s32.totalorder %s281_s0, %s128_s13  ;;  %s16_s10 = int_to_ptr.vmem [resolvable:$true] %s15_s10 }
   0x4   :  { %p132_p1 = scmp.lt.u32.totalorder %s128_s13, %s281_s0 }
   0x6   :  { %p134_p2 = pnand %p132_p1, %p129_p0 }
   0x8   :  { %137 = shalt.err (!%p134_p2)
}
   0x9   :  { %s138_s18 = scalar_lea.vmem %s16_s10, 2048  ;;  %p143_p4 = scmp.lt.s32.totalorder %s16_s10, %s16_s10 }
   0xa   :  { %p139_p3 = scmp.ne.s32.totalorder %s16_s10, %s138_s18  ;;  %p144_p5 = scmp.lt.s32.totalorder %s138_s18, %s138_s18 }
   0xc   :  { %p145_p6 = por %p144_p5, %p143_p4 }
   0xe   :  { %p146_p7 = pnand %p145_p6, %p139_p3 }
  0x10   :  { %149 = shalt.err (!%p146_p7)
}
  0x11   :  { %s201_s19 = smov 128   ;;  %s202_s20 = smov 8  }
  0x12   :  { %21 = dma.hbm_to_vmem [thread:$0]  %s281_s0, 2048, %s16_s10, [#allocation3], %s201_s19, %s201_s19, %s202_s20  }
  0x13   :  { %s203_s23 = smov [#allocation5]   ;;  %s150_s27 = scalar_lea.hbm %s282_s1, 2048 }
  0x14   :  { %s27_s24 = sshll.u32 %s203_s23, 4  ;;  %p151_p8 = scmp.ne.s32.totalorder %s282_s1, %s150_s27  ;;  %s28_s24 = int_to_ptr.vmem [resolvable:$true] %s27_s24 }
  0x15   :  { %p154_p9 = scmp.lt.u32.totalorder %s150_s27, %s282_s1 }
  0x17   :  { %p156_p10 = pnand %p154_p9, %p151_p8 }
  0x19   :  { %159 = shalt.err (!%p156_p10)
}
  0x1a   :  { %s160_s4 = scalar_lea.vmem %s28_s24, 2048  ;;  %p165_p12 = scmp.lt.s32.totalorder %s28_s24, %s28_s24 }
  0x1b   :  { %p161_p11 = scmp.ne.s32.totalorder %s28_s24, %s160_s4  ;;  %p166_p13 = scmp.lt.s32.totalorder %s160_s4, %s160_s4 }
  0x1d   :  { %p167_p0 = por %p166_p13, %p165_p12 }
  0x1f   :  { %p168_p1 = pnand %p167_p0, %p161_p11 }
  0x21   :  { %171 = shalt.err (!%p168_p1)
}
  0x22   :  { %33 = dma.hbm_to_vmem [thread:$0]  %s282_s1, 2048, %s28_s24, [#allocation6], %s201_s19, %s201_s19, %s202_s20  }
  0x23   :  { %194 = dma.done.wait [#allocation3], 2048  }
  0x24   :  { %195 = vsyncadd [#allocation3], 4294965248 }
  0x25   :  { %196 = dma.done.wait [#allocation6], 2048  }
  0x26   :  { %197 = vsyncadd [#allocation6], 4294965248  ;;  %v40_v0 = vld [vmem:[#allocation2] sm:$0xff]  ;;  %vm88_vm0 = vcmask 130048   ;;  %v41_v2 = vld [vmem:[#allocation2 + $0x8] sm:$0xff]  ;;  %s204_s1 = smov [#allocation7]  }
  0x27   :  { %v56_v1 = vld [vmem:[#allocation5] sm:$0xff]  ;;  %v57_v4 = vld [vmem:[#allocation5 + $0x8] sm:$0xff]  ;;  %v42_v5 = vld [vmem:[#allocation2 + $0x10] sm:$0xff]  ;;  %s110_s6 = sshll.u32 %s204_s1, 4  ;;  %s111_s6 = int_to_ptr.vmem [resolvable:$true] %s110_s6 }
  0x28   :  { %v72_v3 = vadd.f32 %v56_v1, %v40_v0  ;;  %v58_v6 = vld [vmem:[#allocation5 + $0x10] sm:$0xff]  ;;  %v73_v7 = vadd.f32 %v57_v4, %v41_v2  ;;  %v43_v9 = vld [vmem:[#allocation2 + $0x18] sm:$0xff]  ;;  %v44_v11 = vld [vmem:[#allocation2 + $0x20] sm:$0xff]  ;;  %s172_s7 = scalar_lea.vmem %s111_s6, 2048  ;;  %p177_p3 = scmp.lt.s32.totalorder %s111_s6, %s111_s6 }
  0x29   :  { %v74_v8 = vadd.f32 %v58_v6, %v42_v5  ;;  %v59_v10 = vld [vmem:[#allocation5 + $0x18] sm:$0xff]  ;;  %v60_v13 = vld [vmem:[#allocation5 + $0x20] sm:$0xff]  ;;  %v45_v14 = vld [vmem:[#allocation2 + $0x28] sm:$0xff]  ;;  %p173_p2 = scmp.ne.s32.totalorder %s111_s6, %s172_s7  ;;  %p178_p4 = scmp.lt.s32.totalorder %s172_s7, %s172_s7 }
  0x2a   :  { %89 = vst.msk [vmem:[#allocation7] sm:$0xff] %vm88_vm0, %v72_v3  ;;  %v75_v12 = vadd.f32 %v59_v10, %v43_v9  ;;  %v61_v15 = vld [vmem:[#allocation5 + $0x28] sm:$0xff]  ;;  %90 = vst.msk [vmem:[#allocation7 + $0x8] sm:$0xff] %vm88_vm0, %v73_v7  ;;  %v76_v16 = vadd.f32 %v60_v13, %v44_v11  ;;  %v46_v18 = vld [vmem:[#allocation2 + $0x30] sm:$0xff] }
  0x2b   :  { %91 = vst.msk [vmem:[#allocation7 + $0x10] sm:$0xff] %vm88_vm0, %v74_v8  ;;  %v77_v17 = vadd.f32 %v61_v15, %v45_v14  ;;  %v62_v19 = vld [vmem:[#allocation5 + $0x30] sm:$0xff]  ;;  %v47_v20 = vld [vmem:[#allocation2 + $0x38] sm:$0xff]  ;;  %v48_v23 = vld [vmem:[#allocation2 + $0x40] sm:$0xff]  ;;  %p179_p5 = por %p178_p4, %p177_p3 }
  0x2c   :  { %92 = vst.msk [vmem:[#allocation7 + $0x18] sm:$0xff] %vm88_vm0, %v75_v12  ;;  %v78_v21 = vadd.f32 %v62_v19, %v46_v18  ;;  %v63_v22 = vld [vmem:[#allocation5 + $0x38] sm:$0xff]  ;;  %v64_v24 = vld [vmem:[#allocation5 + $0x40] sm:$0xff]  ;;  %93 = vst.msk [vmem:[#allocation7 + $0x20] sm:$0xff] %vm88_vm0, %v76_v16 }
  0x2d   :  { %94 = vst.msk [vmem:[#allocation7 + $0x28] sm:$0xff] %vm88_vm0, %v77_v17  ;;  %v79_v25 = vadd.f32 %v63_v22, %v47_v20  ;;  %v80_v26 = vadd.f32 %v64_v24, %v48_v23  ;;  %v49_v27 = vld [vmem:[#allocation2 + $0x48] sm:$0xff]  ;;  %v50_v29 = vld [vmem:[#allocation2 + $0x50] sm:$0xff]  ;;  %v51_v32 = vld [vmem:[#allocation2 + $0x58] sm:$0xff]  ;;  %p180_p6 = pnand %p179_p5, %p173_p2 }
  0x2e   :  { %v65_v28 = vld [vmem:[#allocation5 + $0x48] sm:$0xff]  ;;  %95 = vst.msk [vmem:[#allocation7 + $0x30] sm:$0xff] %vm88_vm0, %v78_v21  ;;  %v66_v31 = vld [vmem:[#allocation5 + $0x50] sm:$0xff]  ;;  %v67_v33 = vld [vmem:[#allocation5 + $0x58] sm:$0xff] }
  0x2f   :  { %v81_v30 = vadd.f32 %v65_v28, %v49_v27  ;;  %96 = vst.msk [vmem:[#allocation7 + $0x38] sm:$0xff] %vm88_vm0, %v79_v25  ;;  %97 = vst.msk [vmem:[#allocation7 + $0x40] sm:$0xff] %vm88_vm0, %v80_v26  ;;  %v82_v34 = vadd.f32 %v66_v31, %v50_v29  ;;  %v83_v35 = vadd.f32 %v67_v33, %v51_v32  ;;  %v52_v36 = vld [vmem:[#allocation2 + $0x60] sm:$0xff]  ;;  %v53_v38 = vld [vmem:[#allocation2 + $0x68] sm:$0xff] }
  0x30   :  { %v68_v37 = vld [vmem:[#allocation5 + $0x60] sm:$0xff]  ;;  %v69_v40 = vld [vmem:[#allocation5 + $0x68] sm:$0xff]  ;;  %v54_v41 = vld [vmem:[#allocation2 + $0x70] sm:$0xff] }
  0x31   :  { %98 = vst.msk [vmem:[#allocation7 + $0x48] sm:$0xff] %vm88_vm0, %v81_v30  ;;  %v84_v39 = vadd.f32 %v68_v37, %v52_v36  ;;  %v70_v42 = vld [vmem:[#allocation5 + $0x70] sm:$0xff]  ;;  %99 = vst.msk [vmem:[#allocation7 + $0x50] sm:$0xff] %vm88_vm0, %v82_v34  ;;  %v85_v43 = vadd.f32 %v69_v40, %v53_v38  ;;  %v55_v45 = vld [vmem:[#allocation2 + $0x78] sm:$0xff] }
  0x32   :  { %100 = vst.msk [vmem:[#allocation7 + $0x58] sm:$0xff] %vm88_vm0, %v83_v35  ;;  %v86_v44 = vadd.f32 %v70_v42, %v54_v41  ;;  %v71_v46 = vld [vmem:[#allocation5 + $0x78] sm:$0xff] }
  0x33   :  { %101 = vst.msk [vmem:[#allocation7 + $0x60] sm:$0xff] %vm88_vm0, %v84_v39  ;;  %v87_v47 = vadd.f32 %v71_v46, %v55_v45  ;;  %102 = vst.msk [vmem:[#allocation7 + $0x68] sm:$0xff] %vm88_vm0, %v85_v43 }
  0x34   :  { %103 = vst.msk [vmem:[#allocation7 + $0x70] sm:$0xff] %vm88_vm0, %v86_v44 }
  0x35   :  { %104 = vst.msk [vmem:[#allocation7 + $0x78] sm:$0xff] %vm88_vm0, %v87_v47 }
  0x36   :  { %183 = shalt.err (!%p180_p6)
}
  0x37   :  { %s184_s10 = scalar_lea.hbm %s283_s2, 2048 }
  0x38   :  { %p185_p7 = scmp.ne.s32.totalorder %s283_s2, %s184_s10  ;;  %p188_p8 = scmp.lt.u32.totalorder %s184_s10, %s283_s2 }
  0x3a   :  { %p190_p9 = pnand %p188_p8, %p185_p7 }
  0x3c   :  { %193 = shalt.err (!%p190_p9)
}
  0x3d   :  { %116 = dma.vmem_to_hbm [thread:$0]  %s111_s6, 2048, %s283_s2, [#allocation4], %s201_s19, %s201_s19, %s202_s20  }
  0x3e   :  { %198 = dma.done.wait [#allocation4], 2048  }
  0x3f   :  { %199 = vsyncadd [#allocation4], 4294965248 }
  0x40   :  { %120 = vsyncpa [#allocation3], 1 }
  0x41   :  { %121 = vsyncpa [#allocation6], 1 }
  0x42   :  { %122 = vsyncpa [#allocation4], 1 }

</bundles_post_ra>
